<compile_context>
chip_gen: v5e
topology: v5e:2x2
jax: 0.10.0
libtpu: 0.0.40
codegen_flags: <defaults>
</compile_context>

<pallas_src>
import functools

import jax
import jax.numpy as jnp
from jax.experimental import pallas as pl
from jax.experimental.pallas import tpu as pltpu

EPS = 1e-5  # PyTorch GroupNorm default


def _block_kernel(x_ref, w3_ref, b_ref, gamma_ref, beta_ref, *rest,
                  cpg, has_scale_shift):
    # x_ref:     (1, C, L+2)         zero-padded input (this batch element)
    # w3_ref:    (ct, 3C)            conv weight, tap-major along K
    # b_ref:     (ct, 1)             conv bias
    # gamma_ref: (ct, 1)             groupnorm weight
    # beta_ref:  (ct, 1)             groupnorm bias
    # rest:      [G (ct,ct) if cpg>1] [scale (1,ct,1), shift (1,ct,1) if ss] out (1,ct,L)
    idx = 0
    G_ref = None
    if cpg > 1:
        G_ref = rest[idx]
        idx += 1
    if has_scale_shift:
        scale_ref = rest[idx]
        shift_ref = rest[idx + 1]
        idx += 2
    o_ref = rest[idx]

    L = o_ref.shape[2]
    x = x_ref[0]                                        # (C, L+2)

    # ---- Conv1d(k=3, pad=1): single fused MXU matmul, contraction K = 3C ----
    x3 = jnp.concatenate([x[:, 0:L], x[:, 1:L + 1], x[:, 2:L + 2]], axis=0)   # (3C, L)
    acc = jnp.dot(w3_ref[...], x3, preferred_element_type=jnp.float32)        # (ct, L) f32, no bias yet

    # ---- one-pass GroupNorm statistics on (ct, 1) vectors (bias folded in) ----
    b = b_ref[...]                                      # (ct, 1)
    s1 = jnp.sum(acc, axis=1, keepdims=True)            # (ct, 1)  sum over L
    s2 = jnp.sum(acc * acc, axis=1, keepdims=True)      # (ct, 1)  sum of squares over L
    Lf = float(L)
    s1b = s1 + Lf * b                                   # sum(conv + bias)
    s2b = s2 + 2.0 * b * s1 + Lf * b * b                # sum((conv + bias)^2)
    if cpg > 1:
        # G already carries 1/(cpg*L): one tiny matmul does reduce AND broadcast.
        mean = jnp.dot(G_ref[...], s1b, preferred_element_type=jnp.float32)   # (ct, 1)
        ex2 = jnp.dot(G_ref[...], s2b, preferred_element_type=jnp.float32)    # (ct, 1)
    else:
        inv_n = 1.0 / Lf
        mean = s1b * inv_n
        ex2 = s2b * inv_n
    var = jnp.maximum(ex2 - mean * mean, 0.0)
    rstd = jax.lax.rsqrt(var + EPS)

    # ---- fused per-channel affine: y = acc * A + Bc  (one mul + one add / elem) ----
    gamma = gamma_ref[...]
    beta = beta_ref[...]
    if has_scale_shift:
        sp1 = scale_ref[0] + 1.0                        # (ct, 1)
        A = rstd * gamma * sp1
        Bc = (b - mean) * A + beta * sp1 + shift_ref[0]
    else:
        A = rstd * gamma
        Bc = (b - mean) * A + beta
    y = acc * A + Bc                                    # (ct, L)

    # ---- SiLU: exp + reciprocal both land on the EUP slot ----
    o_ref[0] = (y * pl.reciprocal(1.0 + jnp.exp(-y))).astype(o_ref.dtype)


def block_forward(x, w, b, gamma, beta, scale_shift=None, *, groups=8,
                  cout_tile=None, compute_dtype=jnp.float32):
    """x: (B, dim, L). w: (dim_out, dim, 3) (PyTorch Conv1d layout). -> (B, dim_out, L)."""
    B, C, L = x.shape
    Cout = w.shape[0]
    assert w.shape == (Cout, C, 3)
    assert Cout % groups == 0, "GroupNorm requires dim_out % groups == 0"
    cpg = Cout // groups

    if cout_tile is None:
        cout_tile = Cout
    assert Cout % cout_tile == 0 and cout_tile % cpg == 0
    if cout_tile != Cout:
        assert cout_tile % 8 == 0, "Cout tiles must be sublane-aligned (multiple of 8)"
    n_ct = Cout // cout_tile

    # ---- glue (cheap XLA-side layout work) ----
    x_pad = jnp.pad(x, ((0, 0), (0, 0), (1, 1))).astype(compute_dtype)       # (B, C, L+2)
    # w3[o, k*C + c] = w[o, c, k]  -- matches the x3 row ordering in-kernel
    w3 = jnp.transpose(w, (0, 2, 1)).reshape(Cout, 3 * C).astype(compute_dtype)
    b2 = b.reshape(Cout, 1).astype(jnp.float32)
    g2 = gamma.reshape(Cout, 1).astype(jnp.float32)
    be2 = beta.reshape(Cout, 1).astype(jnp.float32)

    has_ss = scale_shift is not None

    inputs = [x_pad, w3, b2, g2, be2]
    in_specs = [
        pl.BlockSpec((1, C, L + 2), lambda bi, ci: (bi, 0, 0)),
        pl.BlockSpec((cout_tile, 3 * C), lambda bi, ci: (ci, 0)),
        pl.BlockSpec((cout_tile, 1), lambda bi, ci: (ci, 0)),
        pl.BlockSpec((cout_tile, 1), lambda bi, ci: (ci, 0)),
        pl.BlockSpec((cout_tile, 1), lambda bi, ci: (ci, 0)),
    ]
    if cpg > 1:
        # group membership within one Cout tile, pre-scaled by 1/(cpg*L):
        # mean / E[x^2] come straight out of a (ct,ct)@(ct,1) matmul.
        gid = jnp.arange(cout_tile) // cpg
        G_tile = (gid[:, None] == gid[None, :]).astype(jnp.float32) / float(cpg * L)
        inputs.append(G_tile)
        in_specs.append(pl.BlockSpec((cout_tile, cout_tile), lambda bi, ci: (0, 0)))
    if has_ss:
        scale, shift = scale_shift
        scale = jnp.broadcast_to(scale, (B, Cout, 1)).astype(jnp.float32)
        shift = jnp.broadcast_to(shift, (B, Cout, 1)).astype(jnp.float32)
        inputs += [scale, shift]
        in_specs += [pl.BlockSpec((1, cout_tile, 1), lambda bi, ci: (bi, ci, 0)),
                     pl.BlockSpec((1, cout_tile, 1), lambda bi, ci: (bi, ci, 0))]

    kernel = functools.partial(_block_kernel, cpg=cpg, has_scale_shift=has_ss)

    # ---- explicit VMEM budget: double-buffered blocks + in-kernel temporaries ----
    isz = jnp.dtype(compute_dtype).itemsize
    blk = (C * (L + 2) * isz + cout_tile * 3 * C * isz + cout_tile * L * 4
           + cout_tile * cout_tile * 4 + 8 * cout_tile * 4)
    est = 2 * blk + 3 * C * L * isz + 3 * cout_tile * L * 4
    # Capped at 64 MiB; on v7x (64 MiB physical VMEM) shrink cout_tile / L tiles
    # instead of raising this cap.
    vmem_limit = int(min(64 * 2 ** 20, max(32 * 2 ** 20, 2 * est)))

    return pl.pallas_call(
        kernel,
        out_shape=jax.ShapeDtypeStruct((B, Cout, L), jnp.float32),
        grid=(B, n_ct),
        in_specs=in_specs,
        out_specs=pl.BlockSpec((1, cout_tile, L), lambda bi, ci: (bi, ci, 0)),
        compiler_params=pltpu.CompilerParams(
            dimension_semantics=("parallel", "parallel"),
            vmem_limit_bytes=vmem_limit),
    )(*inputs)


def block_reference(x, w, b, gamma, beta, scale_shift=None, *, groups=8):
    """Pure-JAX reference matching PyTorch semantics (two-pass GroupNorm)."""
    B, C, L = x.shape
    Cout = w.shape[0]
    x_pad = jnp.pad(x, ((0, 0), (0, 0), (1, 1)))
    out = jnp.zeros((B, Cout, L), jnp.float32)
    for k in range(3):
        out = out + jnp.einsum('oc,bcl->bol', w[:, :, k], x_pad[:, :, k:k + L])
    out = out + b[None, :, None]
    g = out.reshape(B, groups, Cout // groups, L)
    mean = jnp.mean(g, axis=(2, 3), keepdims=True)
    var = jnp.mean((g - mean) ** 2, axis=(2, 3), keepdims=True)
    gn = (g - mean) / jnp.sqrt(var + EPS)
    gn = gn.reshape(B, Cout, L) * gamma[None, :, None] + beta[None, :, None]
    if scale_shift is not None:
        scale, shift = scale_shift
        gn = gn * (scale + 1.0) + shift
    return gn * jax.nn.sigmoid(gn)


if __name__ == "__main__":
    B, dim, dim_out, L = 2, 4, 8, 16

    key = jax.random.PRNGKey(0)
    kx, kw, kb, kg, kbe, ks, kh = jax.random.split(key, 7)

    x = jax.random.normal(kx, (B, dim, L), jnp.float32)
    w = jax.random.normal(kw, (dim_out, dim, 3), jnp.float32) * 0.2
    b = jax.random.normal(kb, (dim_out,), jnp.float32) * 0.1
    gamma = 1.0 + 0.1 * jax.random.normal(kg, (dim_out,), jnp.float32)
    beta = 0.1 * jax.random.normal(kbe, (dim_out,), jnp.float32)
    scale = jax.random.normal(ks, (B, dim_out, 1), jnp.float32) * 0.5
    shift = jax.random.normal(kh, (B, dim_out, 1), jnp.float32) * 0.5

    # 1) groups == dim_out (channels_per_group = 1), with scale/shift, f32
    out1 = jax.block_until_ready(
        block_forward(x, w, b, gamma, beta, (scale, shift), groups=8))
    ref1 = block_reference(x, w, b, gamma, beta, (scale, shift), groups=8)
    assert out1.shape == (B, dim_out, L)
    assert jnp.allclose(out1, ref1, atol=1e-4, rtol=1e-4), "case1 mismatch"

    # 2) scale_shift=None -> specialized kernel variant (no scale/shift DMAs)
    out2 = jax.block_until_ready(block_forward(x, w, b, gamma, beta, None, groups=8))
    ref2 = block_reference(x, w, b, gamma, beta, None, groups=8)
    assert jnp.allclose(out2, ref2, atol=1e-4, rtol=1e-4), "case2 mismatch"

    # 3) channels_per_group > 1, Cout tiled across a second parallel grid axis
    dim_out2, groups2, ct2 = 16, 4, 8
    kw2, kb2, kg2, kbe2, ks2, kh2 = jax.random.split(jax.random.PRNGKey(1), 6)
    w2 = jax.random.normal(kw2, (dim_out2, dim, 3), jnp.float32) * 0.2
    bias2 = jax.random.normal(kb2, (dim_out2,), jnp.float32) * 0.1
    gamma2 = 1.0 + 0.1 * jax.random.normal(kg2, (dim_out2,), jnp.float32)
    beta2 = 0.1 * jax.random.normal(kbe2, (dim_out2,), jnp.float32)
    scale2 = jax.random.normal(ks2, (B, dim_out2, 1), jnp.float32) * 0.5
    shift2 = jax.random.normal(kh2, (B, dim_out2, 1), jnp.float32) * 0.5
    out3 = jax.block_until_ready(
        block_forward(x, w2, bias2, gamma2, beta2, (scale2, shift2),
                      groups=groups2, cout_tile=ct2))
    ref3 = block_reference(x, w2, bias2, gamma2, beta2, (scale2, shift2),
                           groups=groups2)
    assert jnp.allclose(out3, ref3, atol=1e-4, rtol=1e-4), "case3 mismatch"

    # 4) bf16 conv inputs + f32 accumulation (v6e/v7x MXU fast path)
    out4 = jax.block_until_ready(
        block_forward(x, w, b, gamma, beta, (scale, shift), groups=8,
                      compute_dtype=jnp.bfloat16))
    assert jnp.allclose(out4, ref1, atol=5e-2, rtol=5e-2), "case4 (bf16) mismatch"

    print("KERNEL_OK")
</pallas_src>

<mosaic_0001>
module attributes {stable_mosaic.version = 11 : i64} {
  func.func @_block_kernel(%arg0: i32, %arg1: i32, %arg2: memref<1x4x18xf32, #tpu.memory_space<vmem>>, %arg3: memref<8x12xf32, #tpu.memory_space<vmem>>, %arg4: memref<8x1xf32, #tpu.memory_space<vmem>>, %arg5: memref<8x1xf32, #tpu.memory_space<vmem>>, %arg6: memref<8x1xf32, #tpu.memory_space<vmem>>, %arg7: memref<1x8x1xf32, #tpu.memory_space<vmem>>, %arg8: memref<1x8x1xf32, #tpu.memory_space<vmem>>, %arg9: memref<1x8x16xf32, #tpu.memory_space<vmem>>) attributes {dimension_semantics = [#tpu.dimension_semantics<parallel>, #tpu.dimension_semantics<parallel>], iteration_bounds = array<i64: 2, 1>, scalar_prefetch = 0 : i64, scratch_operands = 0 : i64, tpu.core_type = #tpu.core_type<tc>, window_params = [{transform_indices = @transform_0, window_bounds = array<i64: 1, 4, 18>}, {transform_indices = @transform_1, window_bounds = array<i64: 8, 12>}, {transform_indices = @transform_2, window_bounds = array<i64: 8, 1>}, {transform_indices = @transform_3, window_bounds = array<i64: 8, 1>}, {transform_indices = @transform_4, window_bounds = array<i64: 8, 1>}, {transform_indices = @transform_5, window_bounds = array<i64: 1, 8, 1>}, {transform_indices = @transform_6, window_bounds = array<i64: 1, 8, 1>}, {transform_indices = @transform_7, window_bounds = array<i64: 1, 8, 16>}]} {
    %c0 = arith.constant 0 : index
    %c0_0 = arith.constant 0 : index
    %c0_1 = arith.constant 0 : index
    %0 = vector.load %arg2[%c0, %c0_0, %c0_1] : memref<1x4x18xf32, #tpu.memory_space<vmem>>, vector<1x4x18xf32>
    %1 = vector.shape_cast %0 : vector<1x4x18xf32> to vector<4x18xf32>
    %2 = vector.extract_strided_slice %1 {offsets = [0, 0], sizes = [4, 16], strides = [1, 1]} : vector<4x18xf32> to vector<4x16xf32>
    %3 = vector.extract_strided_slice %1 {offsets = [0, 1], sizes = [4, 16], strides = [1, 1]} : vector<4x18xf32> to vector<4x16xf32>
    %4 = vector.extract_strided_slice %1 {offsets = [0, 2], sizes = [4, 16], strides = [1, 1]} : vector<4x18xf32> to vector<4x16xf32>
    %5 = tpu.concatenate %2, %3, %4 in 0 : vector<4x16xf32>, vector<4x16xf32>, vector<4x16xf32> -> vector<12x16xf32>
    %c0_2 = arith.constant 0 : index
    %c0_3 = arith.constant 0 : index
    %6 = vector.load %arg3[%c0_2, %c0_3] : memref<8x12xf32, #tpu.memory_space<vmem>>, vector<8x12xf32>
    %cst = arith.constant dense<0.000000e+00> : vector<8x16xf32>
    %7 = tpu.matmul %6, %5, %cst {dimension_numbers = #tpu.dot_dimension_numbers<[1], [0], [0], [1], [0, 0, 1, 1], [], []>} : vector<8x12xf32>, vector<12x16xf32>, vector<8x16xf32> -> vector<8x16xf32>
    %c0_4 = arith.constant 0 : index
    %c0_5 = arith.constant 0 : index
    %8 = vector.load %arg4[%c0_4, %c0_5] : memref<8x1xf32, #tpu.memory_space<vmem>>, vector<8x1xf32>
    %cst_6 = arith.constant dense<0.000000e+00> : vector<8xf32>
    %9 = vector.multi_reduction <add>, %7, %cst_6 [1] : vector<8x16xf32> to vector<8xf32>
    %10 = vector.shape_cast %9 : vector<8xf32> to vector<8x1xf32>
    %11 = arith.mulf %7, %7 : vector<8x16xf32>
    %cst_7 = arith.constant dense<0.000000e+00> : vector<8xf32>
    %12 = vector.multi_reduction <add>, %11, %cst_7 [1] : vector<8x16xf32> to vector<8xf32>
    %13 = vector.shape_cast %12 : vector<8xf32> to vector<8x1xf32>
    %cst_8 = arith.constant 1.600000e+01 : f32
    %14 = vector.broadcast %cst_8 : f32 to vector<8x1xf32>
    %15 = arith.mulf %14, %8 : vector<8x1xf32>
    %16 = arith.addf %10, %15 : vector<8x1xf32>
    %cst_9 = arith.constant 2.000000e+00 : f32
    %17 = vector.broadcast %cst_9 : f32 to vector<8x1xf32>
    %18 = arith.mulf %17, %8 : vector<8x1xf32>
    %19 = arith.mulf %18, %10 : vector<8x1xf32>
    %20 = arith.addf %13, %19 : vector<8x1xf32>
    %cst_10 = arith.constant 1.600000e+01 : f32
    %21 = vector.broadcast %cst_10 : f32 to vector<8x1xf32>
    %22 = arith.mulf %21, %8 : vector<8x1xf32>
    %23 = arith.mulf %22, %8 : vector<8x1xf32>
    %24 = arith.addf %20, %23 : vector<8x1xf32>
    %cst_11 = arith.constant 6.250000e-02 : f32
    %25 = vector.broadcast %cst_11 : f32 to vector<8x1xf32>
    %26 = arith.mulf %16, %25 : vector<8x1xf32>
    %cst_12 = arith.constant 6.250000e-02 : f32
    %27 = vector.broadcast %cst_12 : f32 to vector<8x1xf32>
    %28 = arith.mulf %24, %27 : vector<8x1xf32>
    %29 = arith.mulf %26, %26 : vector<8x1xf32>
    %30 = arith.subf %28, %29 : vector<8x1xf32>
    %cst_13 = arith.constant 0.000000e+00 : f32
    %31 = vector.broadcast %cst_13 : f32 to vector<8x1xf32>
    %32 = arith.maximumf %30, %31 : vector<8x1xf32>
    %cst_14 = arith.constant 9.99999974E-6 : f32
    %33 = vector.broadcast %cst_14 : f32 to vector<8x1xf32>
    %34 = arith.addf %32, %33 : vector<8x1xf32>
    %35 = math.rsqrt %34 : vector<8x1xf32>
    %c0_15 = arith.constant 0 : index
    %c0_16 = arith.constant 0 : index
    %36 = vector.load %arg5[%c0_15, %c0_16] : memref<8x1xf32, #tpu.memory_space<vmem>>, vector<8x1xf32>
    %c0_17 = arith.constant 0 : index
    %c0_18 = arith.constant 0 : index
    %37 = vector.load %arg6[%c0_17, %c0_18] : memref<8x1xf32, #tpu.memory_space<vmem>>, vector<8x1xf32>
    %c0_19 = arith.constant 0 : index
    %c0_20 = arith.constant 0 : index
    %c0_21 = arith.constant 0 : index
    %38 = vector.load %arg7[%c0_19, %c0_20, %c0_21] : memref<1x8x1xf32, #tpu.memory_space<vmem>>, vector<1x8x1xf32>
    %39 = vector.shape_cast %38 : vector<1x8x1xf32> to vector<8x1xf32>
    %cst_22 = arith.constant 1.000000e+00 : f32
    %40 = vector.broadcast %cst_22 : f32 to vector<8x1xf32>
    %41 = arith.addf %39, %40 : vector<8x1xf32>
    %42 = arith.mulf %35, %36 : vector<8x1xf32>
    %43 = arith.mulf %42, %41 : vector<8x1xf32>
    %44 = arith.subf %8, %26 : vector<8x1xf32>
    %45 = arith.mulf %44, %43 : vector<8x1xf32>
    %46 = arith.mulf %37, %41 : vector<8x1xf32>
    %47 = arith.addf %45, %46 : vector<8x1xf32>
    %c0_23 = arith.constant 0 : index
    %c0_24 = arith.constant 0 : index
    %c0_25 = arith.constant 0 : index
    %48 = vector.load %arg8[%c0_23, %c0_24, %c0_25] : memref<1x8x1xf32, #tpu.memory_space<vmem>>, vector<1x8x1xf32>
    %49 = vector.shape_cast %48 : vector<1x8x1xf32> to vector<8x1xf32>
    %50 = arith.addf %47, %49 : vector<8x1xf32>
    %51 = vector.broadcast %43 : vector<8x1xf32> to vector<8x16xf32>
    %52 = arith.mulf %7, %51 : vector<8x16xf32>
    %53 = vector.broadcast %50 : vector<8x1xf32> to vector<8x16xf32>
    %54 = arith.addf %52, %53 : vector<8x16xf32>
    %cst_26 = arith.constant 0.000000e+00 : f32
    %55 = vector.broadcast %cst_26 : f32 to vector<8x16xf32>
    %56 = arith.subf %55, %54 : vector<8x16xf32>
    %57 = math.exp %56 : vector<8x16xf32>
    %cst_27 = arith.constant 1.000000e+00 : f32
    %58 = vector.broadcast %cst_27 : f32 to vector<8x16xf32>
    %59 = arith.addf %58, %57 : vector<8x16xf32>
    %60 = tpu.reciprocal %59 : vector<8x16xf32> -> vector<8x16xf32>
    %61 = arith.mulf %54, %60 : vector<8x16xf32>
    %c0_28 = arith.constant 0 : index
    %c0_29 = arith.constant 0 : index
    %c0_30 = arith.constant 0 : index
    %62 = vector.load %arg9[%c0_28, %c0_29, %c0_30] : memref<1x8x16xf32, #tpu.memory_space<vmem>>, vector<1x8x16xf32>
    %63 = vector.shape_cast %62 : vector<1x8x16xf32> to vector<8x16xf32>
    %64 = vector.shape_cast %61 : vector<8x16xf32> to vector<1x8x16xf32>
    tpu.vector_store %arg9[%c0_28, %c0_29, %c0_30], %64 {strides = array<i32>} : memref<1x8x16xf32, #tpu.memory_space<vmem>>, vector<1x8x16xf32>,
    return
  }
  func.func @transform_0(%arg0: i32, %arg1: i32) -> (i32, i32, i32) {
    %c0_i32 = arith.constant 0 : i32
    %c0_i32_0 = arith.constant 0 : i32
    %c0_i32_1 = arith.constant 0 : i32
    return %arg0, %c0_i32, %c0_i32_0 : i32, i32, i32
  }
  func.func @transform_1(%arg0: i32, %arg1: i32) -> (i32, i32) {
    %c0_i32 = arith.constant 0 : i32
    %c0_i32_0 = arith.constant 0 : i32
    return %arg1, %c0_i32 : i32, i32
  }
  func.func @transform_2(%arg0: i32, %arg1: i32) -> (i32, i32) {
    %c0_i32 = arith.constant 0 : i32
    %c0_i32_0 = arith.constant 0 : i32
    return %arg1, %c0_i32 : i32, i32
  }
  func.func @transform_3(%arg0: i32, %arg1: i32) -> (i32, i32) {
    %c0_i32 = arith.constant 0 : i32
    %c0_i32_0 = arith.constant 0 : i32
    return %arg1, %c0_i32 : i32, i32
  }
  func.func @transform_4(%arg0: i32, %arg1: i32) -> (i32, i32) {
    %c0_i32 = arith.constant 0 : i32
    %c0_i32_0 = arith.constant 0 : i32
    return %arg1, %c0_i32 : i32, i32
  }
  func.func @transform_5(%arg0: i32, %arg1: i32) -> (i32, i32, i32) {
    %c0_i32 = arith.constant 0 : i32
    %c0_i32_0 = arith.constant 0 : i32
    return %arg0, %arg1, %c0_i32 : i32, i32, i32
  }
  func.func @transform_6(%arg0: i32, %arg1: i32) -> (i32, i32, i32) {
    %c0_i32 = arith.constant 0 : i32
    %c0_i32_0 = arith.constant 0 : i32
    return %arg0, %arg1, %c0_i32 : i32, i32, i32
  }
  func.func @transform_7(%arg0: i32, %arg1: i32) -> (i32, i32, i32) {
    %c0_i32 = arith.constant 0 : i32
    %c0_i32_0 = arith.constant 0 : i32
    return %arg0, %arg1, %c0_i32 : i32, i32, i32
  }
}

</mosaic_0001>

<bundles_post_ra>
// kernel: tpu_custom_call.1
= control target key start
LH: loop header
LB: loop body
LE: loop exit
PB: predicated region body
PF: predicated region fallthrough
CT: control target
= control target key end

     0   :  { %12 = vsyncpa [#allocation3], 0  ;;  %s1030_s0 = inlined_call_operand.vmem [shape: f32[2,4,18], index: 0, kind: input, shape index: {}]   ;;  %s1031_s1 = inlined_call_operand.vmem [shape: f32[8,12], index: 1, kind: input, shape index: {}]   ;;  %s1032_s2 = inlined_call_operand.vmem [shape: f32[8,1], index: 2, kind: input, shape index: {}]   ;;  %s1033_s3 = inlined_call_operand.vmem [shape: f32[8,1], index: 3, kind: input, shape index: {}]   ;;  %s1034_s4 = inlined_call_operand.vmem [shape: f32[8,1], index: 4, kind: input, shape index: {}]   ;;  %s1035_s5 = inlined_call_operand.vmem [shape: f32[2,8,1], index: 5, kind: input, shape index: {}]   ;;  %s1036_s6 = inlined_call_operand.vmem [shape: f32[2,8,1], index: 6, kind: input, shape index: {}]   ;;  %s1037_s7 = inlined_call_operand.hbm [shape: f32[2,8,16], index: 7, kind: output, shape index: {}]  }
   0x1   :  { %14 = vsyncpa [#allocation3 + $0x1], 0  ;;  %s908_s24 = smov 0   ;;  %s910_s25 = smov 0  }
   0x2   :  { %s912_s26 = smov 0   ;;  %s914_s27 = smov 0  }
   0x3   :  { %s916_s28 = smov 0   ;;  %s918_s29 = smov 0  }
   0x4 LB: > { %s700_s30 = sadd.s32 4294967295, %s863_s29   ;;  %s701_s8 = sadd.s32 4294967294, %s863_s29   ;;  %s863_s29 = sphi %s918_s29, %s20_s29   ;;  %s859_s28 = sphi %s916_s28, %s1044_s28   ;;  %s855_s27 = sphi %s914_s27, %s1043_s27   ;;  %s851_s26 = sphi %s912_s26, %s1042_s26   ;;  %s847_s25 = sphi %s910_s25, %s1041_s25   ;;  %s843_s24 = sphi %s908_s24, %s1040_s24  }
   0x5   : > { %s32_s9 = sadd.s32 1, %s859_s28  ;;  %s227_s10 = sadd.s32 1, %s851_s26 }
   0x6   : > { %p34_p0 = scmp.ge.s32.totalorder %s32_s9, 2  ;;  %p237_p1 = scmp.ne.s32.totalorder %s851_s26, %s847_s25 }
   0x7   : > { %p238_p2 = scmp.eq.s32.totalorder %s700_s30, 1  ;;  %p243_p3 = scmp.ne.s32.totalorder %s847_s25, %s843_s24 }
   0x8   : > { %s1046_s9 = smov (%p34_p0, %s32_s9), 0  ;;  %p244_p5 = scmp.eq.s32.totalorder %s701_s8, 1 }
   0x9   : > { %p948_p4 = por %p238_p2, %p237_p1  ;;  %s222_s12 = ssub.s32 %s859_s28, %s1046_s9 }
   0xa   : > { %p708_p6 = scmp.ge.s32.totalorder %s863_s29, 1  ;;  %p225_p7 = scmp.eq.s32.totalorder %s222_s12, 0 }
   0xb   : > { %p955_p8 = por %p244_p5, %p243_p3  ;;  %p317_p9 = scmp.lt.s32.totalorder %s863_s29, 3 }
   0xc   : > { %s961_s14 = scalar_select %p225_p7, %s851_s26, %s227_s10  }
   0xd   : > { %p318_p10 = pnand %p708_p6, %p317_p9 }
   0xe   : > { %p378_p11 = scmp.lt.s32.totalorder (!%p318_p10), %s855_s27, 1  ;;  %s865_s20 = smov (!%p318_p10), 126  }
   0xf   : > { %321 = sbr.rel (%p318_p10) target bundleno = 571 (0x23b), region = 48  ;;  %s866_s21 = smov (!%p318_p10), 127  }
  0x10   : > { %s375_s30 = sand.u32 (!%p318_p10), 1, %s847_s25  }
  0x11   : > { %s709_s8 = sshll.u32 (!%p318_p10), %s375_s30, 3 }
  0x12   : > { %s377_s18 = scalar_lea.vmem (!%p318_p10), [#allocation2], %s709_s8  ;;  %s805_s8 = scalar_lea.hbm (!%p318_p10), %s1037_s7, 16 }
  0x14   : > { %s965_s15 = scalar_select %p378_p11, %s855_s27, 1  ;;  %vm420_vm0 = vcmask 1043456   ;;  %v422_v4 = vld [vmem:[%s1031_s1] sm:$0xff]  ;;  %vm423_vm1 = vcmask 97280   ;;  %vm450_vm2 = vcmask 130048   ;;  %v867_v10 = vmov 0  }
  0x15   : > { %777 = vset.pattern.permute.xlu2 %v867_v10  ;;  %778 = vset.pattern.permute.xlu0 %v867_v10  ;;  %v449_v11 = vld [vmem:[%s1032_s2] sm:$0xff] }
  0x16   : > { %s710_s16 = sshll.u32 %s965_s15, 2  ;;  %v458_v13 = vmul.f32 16.0, %v449_v11  ;;  %v460_v14 = vmul.f32 2.0, %v449_v11  ;;  %s711_s10 = sshll.u32 %s965_s15, 3  ;;  %v481_v34 = vld [vmem:[%s1033_s3] sm:$0xff] }
  0x17   : > { %s381_s19 = scalar_lea.vmem %s1030_s0, %s710_s16  ;;  %s404_s17 = scalar_lea.vmem %s1035_s5, %s711_s10  ;;  %v482_v37 = vld [vmem:[%s1034_s4] sm:$0xff] }
  0x18   : > { %v412_v0 = vld [vmem:[%s381_s19] sm:$0xf]  ;;  %v463_v17 = vmul.f32 %v458_v13, %v449_v11  ;;  %s411_s23 = scalar_lea.vmem %s1036_s6, %s711_s10  ;;  %s716_s10 = sshll.u32 %s855_s27, 3 }
  0x19   : > { %418 = vrot.lane.b32.xlu0 %v412_v0, %s865_s20  ;;  %v414_v1 = vrot.slane %v412_v0, 4  ;;  %v483_v32 = vld [vmem:[%s404_s17] sm:$0xff]  ;;  %s537_s17 = scalar_lea.hbm %s1037_s7, %s716_s10  ;;  %s539_s19 = sshll.u32 %s377_s18, 4  ;;  %s540_s19 = int_to_ptr.vmem [resolvable:$true] %s539_s19 }
  0x1a   : > { %v484_v35 = vadd.f32 1.0, %v483_v32  ;;  %v491_v44 = vld [vmem:[%s411_s23] sm:$0xff]  ;;  %s541_s20 = sshll.u32 %s537_s17, 4  ;;  %s526_s27 = scalar_lea.sflag [#allocation3], %s375_s30  ;;  %s542_s20 = int_to_ptr.hbm [resolvable:$true] %s541_s20 }
  0x1b   : > { %s799_s15 = sshra.s32 %s542_s20, 4  ;;  %s800_s15 = int_to_ptr.hbm [resolvable:$true] %s799_s15 }
  0x1c   : > { %v489_v41 = vmul.f32 %v484_v35, %v482_v37  ;;  %p806_p1 = scmp.lt.s32.totalorder %s800_s15, %s1037_s7 }
  0x21   : > { %415 = vrot.lane.b32.xlu0 %v414_v1, %s866_s21  ;;  %s801_s21 = scalar_lea.hbm %s800_s15, 8 }
  0x22   : > { %p802_p12 = scmp.ne.s32.totalorder %s800_s15, %s801_s21  ;;  %p807_p2 = scmp.lt.s32.totalorder %s805_s8, %s801_s21 }
  0x24   : > { %p803_p13 = pnand %p802_p12, %p948_p4  ;;  %p808_p3 = por %p807_p2, %p806_p1 }
  0x26   : > { %p804_p0 = pneg %p803_p13 }
  0x28   : > { %p809_p5 = pnand %p808_p3, %p804_p0 }
  0x8b   : > { %v419_v2 = vpop.permute.xlu0 %418 }
  0x8c   : > { %713 = vmatpush.msk.msra.mxu0 %vm420_vm0, %v419_v2 }
  0x93   : > { %v416_v3 = vpop.permute.xlu0 %415 }
  0x94   : > { %v421_v5 = vsel %vm420_vm0, %v412_v0, %v416_v3 }
  0x95   : > { %444 = vmatpush.msra.mxu0 %v421_v5 }
  0x96   : > { %714 = vmatmul.msk.f32.vlgmr.msra.gmra.mxu0 %vm423_vm1, %v422_v4 }
 0x113   : > { %v446_v6 = vpop.f32.mrf.mxu0 }
 0x114   : > { %v451_v7 = vsel %vm450_vm2, %v446_v6, 0.0  ;;  %v454_v8 = vmul.f32 %v446_v6, %v446_v6 }
 0x115   : > { %452 = vadd.xlane.f32.xlu1 %v451_v7 }
 0x116   : > { %v455_v9 = vsel %vm450_vm2, %v454_v8, 0.0 }
 0x11d   : > { %456 = vadd.xlane.f32.xlu1 %v455_v9 }
 0x188   : > { %v453_v12 = vpop.xlane.xlu1 %452 }
 0x189   : > { %v459_v15 = vadd.f32 %v458_v13, %v453_v12  ;;  %v461_v16 = vmul.f32 %v460_v14, %v453_v12 }
 0x18b   : > { %v465_v19 = vmul.f32 0.0625, %v459_v15 }
 0x18d   : > { %v467_v22 = vmul.f32 %v465_v19, %v465_v19  ;;  %v487_v39 = vsub.f32 %v449_v11, %v465_v19 }
 0x190   : > { %v457_v18 = vpop.xlane.xlu1 %456 }
 0x191   : > { %v462_v20 = vadd.f32 %v461_v16, %v457_v18 }
 0x193   : > { %v464_v21 = vadd.f32 %v463_v17, %v462_v20 }
 0x195   : > { %v466_v23 = vmul.f32 0.0625, %v464_v21 }
 0x197   : > { %v468_v24 = vsub.f32 %v466_v23, %v467_v22 }
 0x199   : > { %v469_v25 = vmax.f32 %v468_v24, 0.0 }
 0x19b   : > { %v470_v26 = vadd.f32 1e-05, %v469_v25 }
 0x19d   : > { %779 = vrsqrt.f32 %v470_v26  ;;  %vm477_vm4 = vweird.f32 %v470_v26 }
 0x1a3   : > { %v780_v27 = vpop.eup %779 }
 0x1a4   : > { %v472_v28 = vmul.f32 %v780_v27, %v470_v26  ;;  %vm478_vm3 = vweird.f32 %v780_v27 }
 0x1a5   : > { %vm479_vm5 = vmor %vm477_vm4, %vm478_vm3 }
 0x1a6   : > { %v473_v29 = vmul.f32 %v780_v27, %v472_v28 }
 0x1a8   : > { %v474_v30 = vmul.f32 0.5, %v473_v29 }
 0x1aa   : > { %v475_v31 = vsub.f32 1.5, %v474_v30 }
 0x1ac   : > { %v476_v33 = vmul.f32 %v780_v27, %v475_v31 }
 0x1ae   : > { %v480_v36 = vsel %vm479_vm5, %v780_v27, %v476_v33 }
 0x1af   : > { %v485_v38 = vmul.f32 %v481_v34, %v480_v36 }
 0x1b1   : > { %v486_v40 = vmul.f32 %v485_v38, %v484_v35 }
 0x1b3   : > { %495 = vperm.xlu2 %777, %v486_v40   ;;  %v488_v42 = vmul.f32 %v487_v39, %v486_v40 }
 0x1b5   : > { %v490_v43 = vadd.f32 %v489_v41, %v488_v42 }
 0x1b7   : > { %v492_v45 = vadd.f32 %v491_v44, %v490_v43 }
 0x1bb   : > { %501 = vperm.xlu2 %777, %v492_v45  }
 0x20d   : > { %v496_v46 = vpop.permute.xlu2 %495 }
 0x20e   : > { %v498_v47 = vmul.f32 %v496_v46, %v446_v6 }
 0x215   : > { %v502_v48 = vpop.permute.xlu2 %501 }
 0x216   : > { %v504_v49 = vadd.f32 %v502_v48, %v498_v47 }
 0x218   : > { %v505_v50 = vsub.f32 0.0, %v504_v49 }
 0x21a   : > { %v506_v51 = vmul.f32 1.442695, %v505_v50 }
 0x21c   : > { %781 = vpow2.f32 %v506_v51 }
 0x222   : > { %v782_v52 = vpop.eup %781 }
 0x223   : > { %v508_v53 = vadd.f32 1.0, %v782_v52 }
 0x225   : > { %783 = vrcp.f32 %v508_v53  ;;  %v520_v57 = vand.u32 2147483648, %v508_v53  ;;  %v518_v59 = vand.u32 2147483647, %v508_v53  ;;  %vm514_vm7 = vweird.f32 %v508_v53 }
 0x227   : > { %v521_v61 = vor.u32 1.1754944e-38, %v520_v57  ;;  %vm519_vm9 = vcmp.eq.f32.partialorder %v518_v59, 8.507059e+37 }
 0x22b   : > { %v784_v54 = vpop.eup %783 }
 0x22c   : > { %v510_v55 = vmul.f32 %v784_v54, %v508_v53  ;;  %vm515_vm6 = vweird.f32 %v784_v54 }
 0x22d   : > { %vm516_vm8 = vmor %vm514_vm7, %vm515_vm6 }
 0x22e   : > { %v511_v56 = vsub.f32 1.0, %v510_v55 }
 0x230   : > { %v512_v58 = vmul.f32 %v784_v54, %v511_v56 }
 0x232   : > { %v513_v60 = vadd.f32 %v784_v54, %v512_v58 }
 0x234   : > { %v517_v62 = vsel %vm516_vm8, %v784_v54, %v513_v60 }
 0x235   : > { %v522_v63 = vsel %vm519_vm9, %v521_v61, %v517_v62 }
 0x236   : > { %v523_v0 = vmul.f32 %v522_v63, %v504_v49 }
 0x238   : > { %524 = vst.msk [vmem:[%s377_s18] sm:$0xff] %vm450_vm2, %v523_v0 }
 0x239   : > { %812 = shalt.err (!%p809_p5)
}
 0x23a   : > { %719 = dma.vmem_to_hbm [thread:$0]  (%p948_p4), %s540_s19, 128, %s542_s20, %s526_s27  }
 0x23b PF: > { %p725_p6 = scmp.ge.s32.totalorder %s863_s29, 2  ;;  %s553_s30 = sand.u32 1, %s843_s24  }
 0x23c   : > { %s554_s16 = scalar_lea.sflag [#allocation3], %s553_s30 }
 0x23d   : > { %p722_p7 = pnand %p725_p6, %p955_p8 }
 0x23f   : > { %p723_p9 = pneg %p722_p7 }
 0x241   : > { %838 = dma.done.wait (%p723_p9), %s554_s16, 128  }
 0x242   : > { %840 = vsyncadd (%p723_p9), %s554_s16, 4294967168  ;;  %s20_s29 = sadd.s32 1, %s863_s29   ;;  %s1040_s24 = smov %s847_s25 }
 0x243   : > { %p17_p10 = scmp.ge.s32.totalorder %s20_s29, 4   ;;  %s1041_s25 = smov %s851_s26 }
 0x244   : > { %s1042_s26 = smov %s961_s14  ;;  %s1043_s27 = smov %s859_s28 }
 0x245   : > { %s1044_s28 = smov %s1046_s9  ;;  %19 = sbr.rel (!%p17_p10) target bundleno = 4 (0x4), region = 101 }
 0x24a   :  { %560 = vsyncpa [#allocation3], 1 }
 0x24b   :  { %562 = vsyncpa [#allocation3 + $0x1], 1 }

</bundles_post_ra>
